<compile_context>
chip_gen: v7x
topology: tpu7x:2x2x1
jax: 0.10.0
libtpu: 0.0.40
codegen_flags: <defaults>
</compile_context>

<pallas_src>
import jax
import jax.numpy as jnp
import numpy as np
from jax import lax
from jax.experimental import pallas as pl
from jax.experimental.pallas import tpu as pltpu

INPUT_DIM = 3
HIDDEN_DIM = 10
OUTPUT_DIM = 1
SEQ_LEN = 8
LANES = 128  # lane width of the packed weight slab


def make_rnn_kernel(seq, in_dim, hid, out_dim):
    """Build the fused kernel with static dims / static slab row offsets baked in."""
    r_wih = 0                       # W_ih^T  : in_dim rows, cols 0:hid
    r_brnn = r_wih + in_dim         # b_ih+b_hh : 1 row,    cols 0:hid
    r_whh = r_brnn + 1              # W_hh^T  : hid rows,   cols 0:hid
    r_wlin = r_whh + hid            # W_lin   : out_dim rows, cols 0:hid   (not transposed)
    r_blin = r_wlin + out_dim       # b_lin   : out_dim rows, col 0        (stored as a column)

    def kernel(x_ref, w_ref, out_ref):
        # Single load of the packed slab; all sub-views are static slices of the value.
        W = w_ref[...]                                            # (rows_padded, 128)
        w_ih_t = W[r_wih:r_wih + in_dim, :hid]                    # (in_dim, hid)
        b_rnn = W[r_brnn:r_brnn + 1, :hid]                        # (1, hid)
        w_hh_t = W[r_whh:r_whh + hid, :hid]                       # (hid, hid)
        w_lin = W[r_wlin:r_wlin + out_dim, :hid]                  # (out_dim, hid)
        b_lin = W[r_blin:r_blin + out_dim, :1]                    # (out_dim, 1)

        # Hoisted input projection for all timesteps: x @ W_ih^T + (b_ih + b_hh).
        pre_x = (jnp.dot(x_ref[...], w_ih_t, preferred_element_type=jnp.float32)
                 + b_rnn)                                         # (seq, hid)

        # Serial recurrence, fully unrolled; hidden states stay as register values.
        h = jnp.zeros((1, hid), jnp.float32)
        hs = []
        for t in range(seq):
            h = jnp.tanh(pre_x[t:t + 1, :]
                         + jnp.dot(h, w_hh_t, preferred_element_type=jnp.float32))
            hs.append(h)
        H = jnp.concatenate(hs, axis=0)                           # (seq, hid)

        # Linear head, emitted transposed so seq lies along lanes: y^T = W_lin @ H^T + b_lin.
        y_t = lax.dot_general(w_lin, H, (((1,), (1,)), ((), ())),
                              preferred_element_type=jnp.float32) + b_lin
        out_ref[...] = y_t                                        # (out_dim, seq)

    return kernel


def pack_weight_slab(params):
    """Pack all weights/biases into one lane-padded f32 slab (done once per parameter set)."""
    hid = params["w_ih"].shape[0]
    in_dim = params["w_ih"].shape[1]
    out_dim = params["w_lin"].shape[0]
    rows = in_dim + 1 + hid + out_dim + out_dim
    rows_padded = ((rows + 7) // 8) * 8

    slab = jnp.zeros((rows_padded, LANES), jnp.float32)
    r = 0
    slab = slab.at[r:r + in_dim, :hid].set(params["w_ih"].T.astype(jnp.float32)); r += in_dim
    slab = slab.at[r:r + 1, :hid].set((params["b_ih"] + params["b_hh"])[None, :]); r += 1
    slab = slab.at[r:r + hid, :hid].set(params["w_hh"].T.astype(jnp.float32)); r += hid
    slab = slab.at[r:r + out_dim, :hid].set(params["w_lin"].astype(jnp.float32)); r += out_dim
    slab = slab.at[r:r + out_dim, :1].set(params["b_lin"][:, None].astype(jnp.float32))
    return slab


@jax.jit
def rnn_model_forward(x, params):
    """x: (seq, input_dim) float32. Returns (1, seq, output_dim), matching the PyTorch module."""
    seq, in_dim = x.shape
    hid = params["w_ih"].shape[0]
    out_dim = params["w_lin"].shape[0]

    slab = pack_weight_slab(params)   # in production this is computed once at load time

    y_t = pl.pallas_call(
        make_rnn_kernel(seq, in_dim, hid, out_dim),
        out_shape=jax.ShapeDtypeStruct((out_dim, seq), jnp.float32),
        in_specs=[
            pl.BlockSpec(memory_space=pltpu.MemorySpace.VMEM),   # x, whole array
            pl.BlockSpec(memory_space=pltpu.MemorySpace.VMEM),   # packed weight slab
        ],
        out_specs=pl.BlockSpec(memory_space=pltpu.MemorySpace.VMEM),
    )(x, slab)

    return y_t.T[None, :, :]  # (1, seq, output_dim) == x.unsqueeze(0) semantics


def reference_forward(x, params):
    """Pure-JAX reference matching torch.nn.RNN(tanh, batch_first) + Linear."""
    def step(h, x_t):
        h_new = jnp.tanh(x_t @ params["w_ih"].T + params["b_ih"]
                         + h @ params["w_hh"].T + params["b_hh"])
        return h_new, h_new

    h0 = jnp.zeros((HIDDEN_DIM,), jnp.float32)
    _, hs = lax.scan(step, h0, x)                      # (seq, hidden)
    y = hs @ params["w_lin"].T + params["b_lin"]       # (seq, output)
    return y[None, :, :]


def init_params(key):
    """Deterministic init mimicking PyTorch's U(-1/sqrt(hidden), 1/sqrt(hidden))."""
    k = 1.0 / np.sqrt(HIDDEN_DIM)
    keys = jax.random.split(key, 6)
    return {
        "w_ih": jax.random.uniform(keys[0], (HIDDEN_DIM, INPUT_DIM), jnp.float32, -k, k),
        "w_hh": jax.random.uniform(keys[1], (HIDDEN_DIM, HIDDEN_DIM), jnp.float32, -k, k),
        "b_ih": jax.random.uniform(keys[2], (HIDDEN_DIM,), jnp.float32, -k, k),
        "b_hh": jax.random.uniform(keys[3], (HIDDEN_DIM,), jnp.float32, -k, k),
        "w_lin": jax.random.uniform(keys[4], (OUTPUT_DIM, HIDDEN_DIM), jnp.float32, -k, k),
        "b_lin": jax.random.uniform(keys[5], (OUTPUT_DIM,), jnp.float32, -k, k),
    }


if __name__ == "__main__":
    key = jax.random.PRNGKey(0)
    pkey, xkey = jax.random.split(key)
    params = init_params(pkey)
    x = jax.random.normal(xkey, (SEQ_LEN, INPUT_DIM), jnp.float32)

    out = jax.block_until_ready(rnn_model_forward(x, params))
    ref = jax.block_until_ready(reference_forward(x, params))

    np.testing.assert_allclose(np.asarray(out), np.asarray(ref), rtol=1e-5, atol=1e-5)
    assert out.shape == (1, SEQ_LEN, OUTPUT_DIM)
    print("KERNEL_OK")
</pallas_src>

<mosaic_0001>
module attributes {stable_mosaic.version = 11 : i64} {
  func.func @kernel(%arg0: memref<8x3xf32, #tpu.memory_space<vmem>>, %arg1: memref<16x128xf32, #tpu.memory_space<vmem>>, %arg2: memref<1x8xf32, #tpu.memory_space<vmem>>) attributes {dimension_semantics = [], scalar_prefetch = 0 : i64, scratch_operands = 0 : i64, tpu.core_type = #tpu.core_type<tc>} {
    %c0 = arith.constant 0 : index
    %c0_0 = arith.constant 0 : index
    %0 = vector.load %arg1[%c0, %c0_0] : memref<16x128xf32, #tpu.memory_space<vmem>>, vector<16x128xf32>
    %1 = vector.extract_strided_slice %0 {offsets = [0, 0], sizes = [3, 10], strides = [1, 1]} : vector<16x128xf32> to vector<3x10xf32>
    %2 = vector.extract_strided_slice %0 {offsets = [3, 0], sizes = [1, 10], strides = [1, 1]} : vector<16x128xf32> to vector<1x10xf32>
    %3 = vector.extract_strided_slice %0 {offsets = [4, 0], sizes = [10, 10], strides = [1, 1]} : vector<16x128xf32> to vector<10x10xf32>
    %4 = vector.extract_strided_slice %0 {offsets = [14, 0], sizes = [1, 10], strides = [1, 1]} : vector<16x128xf32> to vector<1x10xf32>
    %5 = vector.extract_strided_slice %0 {offsets = [15, 0], sizes = [1, 1], strides = [1, 1]} : vector<16x128xf32> to vector<1x1xf32>
    %c0_1 = arith.constant 0 : index
    %c0_2 = arith.constant 0 : index
    %6 = vector.load %arg0[%c0_1, %c0_2] : memref<8x3xf32, #tpu.memory_space<vmem>>, vector<8x3xf32>
    %cst = arith.constant dense<0.000000e+00> : vector<8x10xf32>
    %7 = tpu.matmul %6, %1, %cst {dimension_numbers = #tpu.dot_dimension_numbers<[1], [0], [0], [1], [0, 0, 1, 1], [], []>} : vector<8x3xf32>, vector<3x10xf32>, vector<8x10xf32> -> vector<8x10xf32>
    %8 = vector.broadcast %2 : vector<1x10xf32> to vector<8x10xf32>
    %9 = arith.addf %7, %8 : vector<8x10xf32>
    %cst_3 = arith.constant 0.000000e+00 : f32
    %10 = vector.broadcast %cst_3 : f32 to vector<1x10xf32>
    %11 = vector.extract_strided_slice %9 {offsets = [0, 0], sizes = [1, 10], strides = [1, 1]} : vector<8x10xf32> to vector<1x10xf32>
    %cst_4 = arith.constant dense<0.000000e+00> : vector<1x10xf32>
    %12 = tpu.matmul %10, %3, %cst_4 {dimension_numbers = #tpu.dot_dimension_numbers<[1], [0], [0], [1], [0, 0, 1, 1], [], []>} : vector<1x10xf32>, vector<10x10xf32>, vector<1x10xf32> -> vector<1x10xf32>
    %13 = arith.addf %11, %12 : vector<1x10xf32>
    %14 = math.tanh %13 : vector<1x10xf32>
    %15 = vector.extract_strided_slice %9 {offsets = [1, 0], sizes = [1, 10], strides = [1, 1]} : vector<8x10xf32> to vector<1x10xf32>
    %cst_5 = arith.constant dense<0.000000e+00> : vector<1x10xf32>
    %16 = tpu.matmul %14, %3, %cst_5 {dimension_numbers = #tpu.dot_dimension_numbers<[1], [0], [0], [1], [0, 0, 1, 1], [], []>} : vector<1x10xf32>, vector<10x10xf32>, vector<1x10xf32> -> vector<1x10xf32>
    %17 = arith.addf %15, %16 : vector<1x10xf32>
    %18 = math.tanh %17 : vector<1x10xf32>
    %19 = vector.extract_strided_slice %9 {offsets = [2, 0], sizes = [1, 10], strides = [1, 1]} : vector<8x10xf32> to vector<1x10xf32>
    %cst_6 = arith.constant dense<0.000000e+00> : vector<1x10xf32>
    %20 = tpu.matmul %18, %3, %cst_6 {dimension_numbers = #tpu.dot_dimension_numbers<[1], [0], [0], [1], [0, 0, 1, 1], [], []>} : vector<1x10xf32>, vector<10x10xf32>, vector<1x10xf32> -> vector<1x10xf32>
    %21 = arith.addf %19, %20 : vector<1x10xf32>
    %22 = math.tanh %21 : vector<1x10xf32>
    %23 = vector.extract_strided_slice %9 {offsets = [3, 0], sizes = [1, 10], strides = [1, 1]} : vector<8x10xf32> to vector<1x10xf32>
    %cst_7 = arith.constant dense<0.000000e+00> : vector<1x10xf32>
    %24 = tpu.matmul %22, %3, %cst_7 {dimension_numbers = #tpu.dot_dimension_numbers<[1], [0], [0], [1], [0, 0, 1, 1], [], []>} : vector<1x10xf32>, vector<10x10xf32>, vector<1x10xf32> -> vector<1x10xf32>
    %25 = arith.addf %23, %24 : vector<1x10xf32>
    %26 = math.tanh %25 : vector<1x10xf32>
    %27 = vector.extract_strided_slice %9 {offsets = [4, 0], sizes = [1, 10], strides = [1, 1]} : vector<8x10xf32> to vector<1x10xf32>
    %cst_8 = arith.constant dense<0.000000e+00> : vector<1x10xf32>
    %28 = tpu.matmul %26, %3, %cst_8 {dimension_numbers = #tpu.dot_dimension_numbers<[1], [0], [0], [1], [0, 0, 1, 1], [], []>} : vector<1x10xf32>, vector<10x10xf32>, vector<1x10xf32> -> vector<1x10xf32>
    %29 = arith.addf %27, %28 : vector<1x10xf32>
    %30 = math.tanh %29 : vector<1x10xf32>
    %31 = vector.extract_strided_slice %9 {offsets = [5, 0], sizes = [1, 10], strides = [1, 1]} : vector<8x10xf32> to vector<1x10xf32>
    %cst_9 = arith.constant dense<0.000000e+00> : vector<1x10xf32>
    %32 = tpu.matmul %30, %3, %cst_9 {dimension_numbers = #tpu.dot_dimension_numbers<[1], [0], [0], [1], [0, 0, 1, 1], [], []>} : vector<1x10xf32>, vector<10x10xf32>, vector<1x10xf32> -> vector<1x10xf32>
    %33 = arith.addf %31, %32 : vector<1x10xf32>
    %34 = math.tanh %33 : vector<1x10xf32>
    %35 = vector.extract_strided_slice %9 {offsets = [6, 0], sizes = [1, 10], strides = [1, 1]} : vector<8x10xf32> to vector<1x10xf32>
    %cst_10 = arith.constant dense<0.000000e+00> : vector<1x10xf32>
    %36 = tpu.matmul %34, %3, %cst_10 {dimension_numbers = #tpu.dot_dimension_numbers<[1], [0], [0], [1], [0, 0, 1, 1], [], []>} : vector<1x10xf32>, vector<10x10xf32>, vector<1x10xf32> -> vector<1x10xf32>
    %37 = arith.addf %35, %36 : vector<1x10xf32>
    %38 = math.tanh %37 : vector<1x10xf32>
    %39 = vector.extract_strided_slice %9 {offsets = [7, 0], sizes = [1, 10], strides = [1, 1]} : vector<8x10xf32> to vector<1x10xf32>
    %cst_11 = arith.constant dense<0.000000e+00> : vector<1x10xf32>
    %40 = tpu.matmul %38, %3, %cst_11 {dimension_numbers = #tpu.dot_dimension_numbers<[1], [0], [0], [1], [0, 0, 1, 1], [], []>} : vector<1x10xf32>, vector<10x10xf32>, vector<1x10xf32> -> vector<1x10xf32>
    %41 = arith.addf %39, %40 : vector<1x10xf32>
    %42 = math.tanh %41 : vector<1x10xf32>
    %43 = tpu.concatenate %14, %18, %22, %26, %30, %34, %38, %42 in 0 : vector<1x10xf32>, vector<1x10xf32>, vector<1x10xf32>, vector<1x10xf32>, vector<1x10xf32>, vector<1x10xf32>, vector<1x10xf32>, vector<1x10xf32> -> vector<8x10xf32>
    %cst_12 = arith.constant dense<0.000000e+00> : vector<1x8xf32>
    %44 = tpu.matmul %4, %43, %cst_12 {dimension_numbers = #tpu.dot_dimension_numbers<[1], [1], [0], [0], [0, 0, 1, 0], [], []>} : vector<1x10xf32>, vector<8x10xf32>, vector<1x8xf32> -> vector<1x8xf32>
    %45 = vector.broadcast %5 : vector<1x1xf32> to vector<1x8xf32>
    %46 = arith.addf %44, %45 : vector<1x8xf32>
    %c0_13 = arith.constant 0 : index
    %c0_14 = arith.constant 0 : index
    %47 = vector.load %arg2[%c0_13, %c0_14] : memref<1x8xf32, #tpu.memory_space<vmem>>, vector<1x8xf32>
    tpu.vector_store %arg2[%c0_13, %c0_14], %46 {strides = array<i32>} : memref<1x8xf32, #tpu.memory_space<vmem>>, vector<1x8xf32>,
    return
  }
}

</mosaic_0001>

<bundles_post_ra>
// kernel: rnn_model_forward.1
= control target key start
LH: loop header
LB: loop body
LE: loop exit
PB: predicated region body
PF: predicated region fallthrough
CT: control target
= control target key end

     0   :  { %vm23_vm0 = vcmask 1042432   ;;  %vm98_vm1 = vcmask 1043456   ;;  %v1034_v2 = vmov 0.0   ;;  %vm1035_vm2 = vmmov 0   ;;  %s1159_s0 = inlined_call_operand.vmem [shape: f32[8,3], index: 0, kind: input, shape index: {}]   ;;  %s1160_s1 = inlined_call_operand.vmem [shape: f32[16,128], index: 1, kind: input, shape index: {}]   ;;  %s1161_s2 = inlined_call_operand.hbm [shape: f32[1,8], index: 2, kind: output, shape index: {}]  }
   0x1   :  { %v12_v0 = vld [vmem:[%s1160_s1] sm:$0xff]  ;;  %v1061_v1 = vld [vmem:[%s1160_s1 + $0x8] sm:$0xff]  ;;  %889 = vmatprep.subr.mxu0 %v1034_v2  ;;  %891 = vmatprep.mubr.msk.f32.mxu0 %vm1035_vm2, %v1034_v2  ;;  %vm19_vm3 = vcmask 23552   ;;  %v1036_v6 = vmov 0.0|0.0   ;;  %vm107_vm4 = vcmask 1041408  }
   0x2   :  { %v99_v3 = vrot.slane %v12_v0, 4  ;;  %v100_v4 = vrot.slane %v1061_v1, 4  ;;  %v14_v5 = vld [vmem:[%s1159_s0] sm:$0xff]  ;;  %890 = vmatpush3.msk.msra.mxu0 %vm23_vm0, %v12_v0  ;;  %955 = vmatprep.subr.bf16.mxu1 %v1036_v6 }
   0x3   :  { %7 = vsyncpa [#allocation3], 0  ;;  %892 = vmatmul.mubr.msk.f32.vlgmr.msra.gmra.mrb[0].mxu0 %vm19_vm3, %v14_v5  ;;  %vm1037_vm5 = vmmov 1   ;;  %898 = vmatprep.mubr.msk.f32.mxu1 %vm1035_vm2, %v1034_v2  ;;  %v15_v10 = vlaneseq  ;;  %vm103_vm7 = vcmask 80896   ;;  %vm734_vm8 = vcmask 1040384   ;;  %s1039_s0 = smov [#allocation2]  }
   0x4   :  { %v101_v7 = vsel %vm98_vm1, %v99_v3, %v100_v4  ;;  %vm1073_vm6 = vmpackc.low %vm107_vm4, %vm1037_vm5  ;;  %959 = vmatprep.subr.bf16.mxu0 %v1036_v6  ;;  %905 = vmatprep.mubr.msk.f32.mxu0 %vm1035_vm2, %v1034_v2  ;;  %vm739_vm9 = vcmask 1044480   ;;  %vm741_vm10 = vcmask 1045504   ;;  %v1038_v63 = vmov 0   ;;  %s834_s1 = sshll.u32 %s1039_s0, 4  ;;  %s835_s1 = int_to_ptr.vmem [resolvable:$true] %s834_s1 }
   0x5   :  { %v1079_v9 = vpack.c.bf16 %v100_v4, %v101_v7  ;;  %v16_v11 = vshrl.u32 %v15_v10, 7  ;;  %993 = vset.pattern.permute.xlu0 %v1038_v63  ;;  %vm743_vm11 = vcmask 1046528   ;;  %v748_v7 = vrot.slane %v1061_v1, 6  ;;  %s1010_s15 = scalar_lea.vmem %s835_s1, 16  ;;  %s1014_s16 = scalar_lea.vmem %s835_s1, 32 }
   0x6   :  { %746 = vperm.xlu0 %993, %v1061_v1   ;;  %vm826_vm12 = vcmask 57344   ;;  %p1011_p0 = scmp.ne.s32.totalorder %s835_s1, %s1010_s15  ;;  %p1015_p1 = scmp.lt.s32.totalorder %s835_s1, %s835_s1 }
   0x7   :  { %958 = vmatpush3.bf16.msk.msra.mxu1 %vm1073_vm6, %v1079_v9  ;;  %962 = vmatpush3.bf16.msk.msra.mxu0 %vm1073_vm6, %v1079_v9  ;;  %v17_v12 = vsub.s32 3, %v16_v11  ;;  %p1016_p2 = scmp.lt.s32.totalorder %s1014_s16, %s1010_s15 }
   0x8   :  { %963 = vmatprep.subr.bf16.mxu1 %v1036_v6  ;;  %967 = vmatprep.subr.bf16.mxu0 %v1036_v6 }
   0x9   :  { %v18_v13 = vrot.slane %v12_v0, %v17_v12  ;;  %p1017_p3 = por %p1016_p2, %p1015_p1 }
   0xa   :  { %899 = vmatmul.mubr.f32.vlgmr.msra.gmra.mrb[0].mxu1 %v1034_v2 }
   0xb   :  { %966 = vmatpush3.bf16.msk.msra.mxu1 %vm1073_vm6, %v1079_v9  ;;  %912 = vmatprep.mubr.msk.f32.mxu1 %vm1035_vm2, %v1034_v2  ;;  %p1018_p4 = pnand %p1017_p3, %p1011_p0 }
   0xc   :  { %971 = vmatprep.subr.bf16.mxu1 %v1036_v6 }
  0x85   :  { %v747_v8 = vpop.permute.xlu0 %746 }
  0xd6   :  { %v93_v14 = vpop.f32.mrb[0].mxu0 }
  0xd7   :  { %v1095_v15 = vadd.f32 %v93_v14, %v18_v13  ;;  %v893_v16 = vpop.f32.mrb[1].mxu0 }
  0xdd   :  { %v176_v17 = vpop.f32.mrb[0].mxu1 }
  0xde   :  { %v180_v18 = vadd.f32 %v176_v17, %v1095_v15  ;;  %v900_v19 = vpop.f32.mrb[1].mxu1 }
  0xe0   :  { %994 = vtanh.f32 %v180_v18 }
  0xea   :  { %v995_v20 = vpop.eup %994 }
  0xeb   :  { %906 = vmatmul.mubr.msk.f32.vlgmr.msra.gmra.mrb[2].mxu0 %vm103_vm7, %v995_v20 }
  0xec   :  { %970 = vmatpush3.bf16.msk.msra.mxu0 %vm1073_vm6, %v1079_v9  ;;  %919 = vmatprep.mubr.msk.f32.mxu0 %vm1035_vm2, %v1034_v2 }
  0xed   :  { %975 = vmatprep.subr.bf16.mxu0 %v1036_v6 }
 0x1be   :  { %v251_v21 = vpop.f32.mrb[2].mxu0 }
 0x1bf   :  { %v256_v22 = vrot.slane %v251_v21, 7  ;;  %v907_v23 = vpop.f32.mrb[3].mxu0 }
 0x1c1   :  { %v258_v24 = vadd.f32 %v256_v22, %v1095_v15 }
 0x1c3   :  { %996 = vtanh.f32 %v258_v24 }
 0x1cd   :  { %v997_v25 = vpop.eup %996 }
 0x1ce   :  { %v261_v26 = vrot.slane %v997_v25, 1  ;;  %v735_v32 = vsel %vm734_vm8, %v995_v20, %v997_v25 }
 0x1d0   :  { %913 = vmatmul.mubr.msk.f32.vlgmr.msra.gmra.mrb[2].mxu1 %vm103_vm7, %v261_v26 }
 0x1d1   :  { %974 = vmatpush3.bf16.msk.msra.mxu1 %vm1073_vm6, %v1079_v9  ;;  %926 = vmatprep.mubr.msk.f32.mxu1 %vm1035_vm2, %v1034_v2 }
 0x1d2   :  { %979 = vmatprep.subr.bf16.mxu1 %v1036_v6 }
 0x2a3   :  { %v330_v27 = vpop.f32.mrb[2].mxu1 }
 0x2a4   :  { %v335_v28 = vrot.slane %v330_v27, 6  ;;  %v914_v29 = vpop.f32.mrb[3].mxu1 }
 0x2a6   :  { %v337_v30 = vadd.f32 %v335_v28, %v1095_v15 }
 0x2a8   :  { %998 = vtanh.f32 %v337_v30 }
 0x2b2   :  { %v999_v31 = vpop.eup %998 }
 0x2b3   :  { %v340_v33 = vrot.slane %v999_v31, 2  ;;  %v736_v34 = vsel %vm107_vm4, %v735_v32, %v999_v31 }
 0x2b5   :  { %920 = vmatmul.mubr.msk.f32.vlgmr.msra.gmra.mrb[4].mxu0 %vm103_vm7, %v340_v33 }
 0x2b6   :  { %978 = vmatpush3.bf16.msk.msra.mxu0 %vm1073_vm6, %v1079_v9  ;;  %933 = vmatprep.mubr.msk.f32.mxu0 %vm1035_vm2, %v1034_v2 }
 0x2b7   :  { %983 = vmatprep.subr.bf16.mxu0 %v1036_v6 }
 0x388   :  { %v409_v35 = vpop.f32.mrb[4].mxu0 }
 0x389   :  { %v414_v36 = vrot.slane %v409_v35, 5  ;;  %v921_v37 = vpop.f32.mrb[5].mxu0 }
 0x38b   :  { %v416_v38 = vadd.f32 %v414_v36, %v1095_v15 }
 0x38d   :  { %1000 = vtanh.f32 %v416_v38 }
 0x397   :  { %v1001_v39 = vpop.eup %1000 }
 0x398   :  { %v419_v40 = vrot.slane %v1001_v39, 3  ;;  %v737_v41 = vsel %vm23_vm0, %v736_v34, %v1001_v39 }
 0x39a   :  { %927 = vmatmul.mubr.msk.f32.vlgmr.msra.gmra.mrb[4].mxu1 %vm103_vm7, %v419_v40 }
 0x39b   :  { %982 = vmatpush3.bf16.msk.msra.mxu1 %vm1073_vm6, %v1079_v9  ;;  %940 = vmatprep.mubr.msk.f32.mxu1 %vm1035_vm2, %v1034_v2 }
 0x39c   :  { %950 = vmatprep.subr.mxu1 %v1034_v2 }
 0x46d   :  { %v488_v42 = vpop.f32.mrb[4].mxu1 }
 0x46e   :  { %v493_v43 = vrot.slane %v488_v42, 4  ;;  %v928_v44 = vpop.f32.mrb[5].mxu1 }
 0x470   :  { %v495_v45 = vadd.f32 %v493_v43, %v1095_v15 }
 0x472   :  { %1002 = vtanh.f32 %v495_v45 }
 0x47c   :  { %v1003_v46 = vpop.eup %1002 }
 0x47d   :  { %v498_v47 = vrot.slane %v1003_v46, 4  ;;  %v738_v48 = vsel %vm98_vm1, %v737_v41, %v1003_v46 }
 0x47f   :  { %934 = vmatmul.mubr.msk.f32.vlgmr.msra.gmra.mrb[6].mxu0 %vm103_vm7, %v498_v47 }
 0x480   :  { %986 = vmatpush3.bf16.msk.msra.mxu0 %vm1073_vm6, %v1079_v9  ;;  %947 = vmatprep.mubr.msk.f32.mxu0 %vm1035_vm2, %v1034_v2  ;;  %v749_v9 = vrot.slane %v747_v8, 7 }
 0x552   :  { %v567_v49 = vpop.f32.mrb[6].mxu0 }
 0x553   :  { %v572_v50 = vrot.slane %v567_v49, 3  ;;  %v935_v51 = vpop.f32.mrb[7].mxu0 }
 0x555   :  { %v574_v52 = vadd.f32 %v572_v50, %v1095_v15 }
 0x557   :  { %1004 = vtanh.f32 %v574_v52 }
 0x561   :  { %v1005_v53 = vpop.eup %1004 }
 0x562   :  { %v577_v54 = vrot.slane %v1005_v53, 5  ;;  %v740_v55 = vsel %vm739_vm9, %v738_v48, %v1005_v53 }
 0x564   :  { %941 = vmatmul.mubr.msk.f32.vlgmr.msra.gmra.mrb[6].mxu1 %vm103_vm7, %v577_v54 }
 0x565   :  { %952 = vmatprep.mubr.msk.f32.mxu1 %vm1035_vm2, %v1034_v2 }
 0x637   :  { %v646_v56 = vpop.f32.mrb[6].mxu1 }
 0x638   :  { %v651_v57 = vrot.slane %v646_v56, 2  ;;  %v942_v58 = vpop.f32.mrb[7].mxu1 }
 0x63a   :  { %v653_v59 = vadd.f32 %v651_v57, %v1095_v15 }
 0x63c   :  { %1006 = vtanh.f32 %v653_v59 }
 0x646   :  { %v1007_v60 = vpop.eup %1006 }
 0x647   :  { %v656_v61 = vrot.slane %v1007_v60, 6  ;;  %v742_v62 = vsel %vm741_vm10, %v740_v55, %v1007_v60 }
 0x649   :  { %948 = vmatmul.mubr.msk.f32.vlgmr.msra.gmra.mrb[8].mxu0 %vm103_vm7, %v656_v61 }
 0x71c   :  { %v725_v0 = vpop.f32.mrb[8].mxu0 }
 0x71d   :  { %v730_v3 = vrot.slane %v725_v0, 1  ;;  %v949_v4 = vpop.f32.mrb[9].mxu0 }
 0x71f   :  { %v732_v2 = vadd.f32 %v730_v3, %v1095_v15 }
 0x721   :  { %1008 = vtanh.f32 %v732_v2 }
 0x72b   :  { %v1009_v5 = vpop.eup %1008 }
 0x72c   :  { %v744_v6 = vsel %vm743_vm11, %v742_v62, %v1009_v5 }
 0x72d   :  { %951 = vmatpush3.xpose.msk.msra.mxu1 %vm103_vm7, %v744_v6 }
 0x730   :  { %953 = vmatmul.mubr.msk.f32.vlgmr.msra.gmra.mrb[8].mxu1 %vm103_vm7, %v748_v7 }
 0x803   :  { %v822_v10 = vpop.f32.mrb[8].mxu1 }
 0x804   :  { %v823_v11 = vadd.f32 %v822_v10, %v749_v9  ;;  %v954_v12 = vpop.f32.mrb[9].mxu1 }
 0x806   :  { %827 = vst.msk [vmem:[#allocation2] sm:$0x1] %vm826_vm12, %v823_v11 }
 0x807   :  { %1021 = shalt.err (!%p1018_p4)
}
 0x808   :  { %s1022_s19 = scalar_lea.hbm %s1161_s2, 16 }
 0x809   :  { %p1023_p5 = scmp.ne.s32.totalorder %s1161_s2, %s1022_s19  ;;  %p1026_p6 = scmp.lt.u32.totalorder %s1022_s19, %s1161_s2 }
 0x80b   :  { %p1028_p7 = pnand %p1026_p6, %p1023_p5 }
 0x80d   :  { %1031 = shalt.err (!%p1028_p7)
}
 0x80e   :  { %837 = dma.vmem_to_hbm [thread:$0]  %s835_s1, 16, %s1161_s2, [#allocation3]  }
 0x80f   :  { %1032 = dma.done.wait [#allocation3], 16  }
 0x810   :  { %1033 = vsyncadd [#allocation3], 4294967280 }
 0x811   :  { %841 = vsyncpa [#allocation3], 1 }

</bundles_post_ra>
